<compile_context>
chip_gen: v5e
topology: v5e:2x2
jax: 0.10.0
libtpu: 0.0.40
codegen_flags: <defaults>
</compile_context>

<pallas_src>
import functools

import jax
import jax.numpy as jnp
from jax.experimental import pallas as pl
from jax.experimental.pallas import tpu as pltpu

_BN_EPS = 1e-5  # nn.BatchNorm2d default


def _bn_relu(y, gamma, beta, eps):
    """Train-mode BatchNorm2d over (batch, spatial) + ReLU, in scale/shift form.

    y: (N, C, P) f32; gamma/beta: (1, C, 1) f32.
    Per-element cost: 1 mul + 1 add + 1 max; stats are per-channel scalars.
    """
    cnt = y.shape[0] * y.shape[2]
    # Chained single-axis reductions: leading-dim add, then cross-lane reduce.
    mean = jnp.sum(jnp.sum(y, axis=0, keepdims=True), axis=2, keepdims=True) / cnt
    mean_sq = jnp.sum(jnp.sum(y * y, axis=0, keepdims=True), axis=2, keepdims=True) / cnt
    var = jnp.maximum(mean_sq - mean * mean, 0.0)       # guard f32 cancellation
    scale = gamma * jax.lax.rsqrt(var + eps)            # EUP rsqrt, per-channel only
    shift = beta - mean * scale
    return jnp.maximum(y * scale + shift, 0.0)


def _resblock_kernel(x_ref, w1_ref, w2_ref, w3_ref, bn_ref, mask_ref, out_ref,
                     *, n, h, w, eps):
    """Fused ResBlock forward; everything resident in VMEM, single grid step.

    Ref shapes:
      x_ref   : (N, Cin, P)        P = H*W on lanes (free reshape of NCHW)
      w1_ref  : (Cm_p, Cin)        convR1 1x1 weight (bottleneck padded to Cm_p)
      w2_ref  : (Cm_p, 9*Cm_p)     convR2 3x3 weight, K index = tap*Cm_p + in_ch
      w3_ref  : (Cout, Cm_p)       convR3 1x1 weight
      bn_ref  : (2*(2*Cm_p+Cout),1) packed [gammas | betas], stage-major
      mask_ref: (9*Cm_p, P)        f32 boundary-validity per tap, pre-broadcast
      out_ref : (N, Cout, P)       lane-dense output
    """
    p = h * w
    cm_p = w1_ref.shape[0]
    cout = w3_ref.shape[0]
    nbn = 2 * cm_p + cout

    x = x_ref[...]                     # (N, Cin, P)
    w1 = w1_ref[...]
    w2 = w2_ref[...]
    w3 = w3_ref[...]
    bn = bn_ref[...]                   # (2*nbn, 1)
    mask = mask_ref[...]               # (9*Cm_p, P)

    def gamma_beta(lo, hi):            # sublane-aligned static slices of the packed BN vector
        g = bn[lo:hi].reshape(1, hi - lo, 1)
        b = bn[nbn + lo:nbn + hi].reshape(1, hi - lo, 1)
        return g, b

    def cmatmul(wgt, act):             # (Co, Ci) x (N, Ci, P) -> (N, Co, P), per-image MXU dots
        return jnp.stack(
            [jnp.dot(wgt, act[i], preferred_element_type=jnp.float32) for i in range(n)],
            axis=0)

    # ---- stage 1: 1x1 conv -> BN -> ReLU ------------------------------------------
    g1, b1 = gamma_beta(0, cm_p)
    x1 = _bn_relu(cmatmul(w1, x), g1, b1, eps)                       # (N, Cm_p, P)

    # ---- stage 2: 3x3 conv (pad=1) as 9 lane-rolled taps -> ONE K=9*Cm_p matmul ----
    def stage2_one(xi):                # (Cm_p, P) -> (Cm_p, P)
        taps = []
        for dh in (-1, 0, 1):
            for dw in (-1, 0, 1):
                off = dh * w + dw
                taps.append(xi if off == 0
                            else pltpu.roll(xi, shift=(-off) % p, axis=1))
        stacked = jnp.concatenate(taps, axis=0) * mask               # (9*Cm_p, P)
        return jnp.dot(w2, stacked, preferred_element_type=jnp.float32)

    y2 = jnp.stack([stage2_one(x1[i]) for i in range(n)], axis=0)    # (N, Cm_p, P)
    g2, b2 = gamma_beta(cm_p, 2 * cm_p)
    x2 = _bn_relu(y2, g2, b2, eps)

    # ---- stage 3: 1x1 conv -> BN -> ReLU ------------------------------------------
    g3, b3 = gamma_beta(2 * cm_p, nbn)
    x3 = _bn_relu(cmatmul(w3, x2), g3, b3, eps)                      # (N, Cout, P)

    # ---- residual add + final ReLU; single lane-dense store ------------------------
    out_ref[...] = jnp.maximum(x + x3, 0.0)


def prepare_resblock_params(params, h, w):
    """One-time re-layout of PyTorch-shaped ResBlock parameters into kernel form."""
    (w1_pt, g1, b1, w2_pt, g2, b2, w3_pt, g3, b3) = params
    cm, cin = w1_pt.shape[0], w1_pt.shape[1]
    cout = w3_pt.shape[0]
    cm_p = max(8, -(-cm // 8) * 8)     # pad bottleneck channels to a sublane multiple
    pc = cm_p - cm

    # 1x1 weights.
    w1 = jnp.pad(jnp.asarray(w1_pt, jnp.float32).reshape(cm, cin), ((0, pc), (0, 0)))
    w3 = jnp.pad(jnp.asarray(w3_pt, jnp.float32).reshape(cout, cm), ((0, 0), (0, pc)))

    # 3x3 weight (o, i, kh, kw) -> (o, kh, kw, i) -> (o, 9*cm_p); K = tap*cm_p + i.
    w2 = jnp.pad(jnp.asarray(w2_pt, jnp.float32), ((0, pc), (0, pc), (0, 0), (0, 0)))
    w2 = jnp.transpose(w2, (0, 2, 3, 1)).reshape(cm_p, 9 * cm_p)

    # Packed BN params: rows [0, nbn) = gammas (stage1|stage2|stage3), [nbn, 2*nbn) = betas.
    # Padded channels get gamma=1 / beta=0 so they stay exactly zero through BN/ReLU.
    def padc(v, val):
        return jnp.pad(jnp.asarray(v, jnp.float32), (0, pc), constant_values=val)

    gammas = jnp.concatenate([padc(g1, 1.0), padc(g2, 1.0), jnp.asarray(g3, jnp.float32)])
    betas = jnp.concatenate([padc(b1, 0.0), padc(b2, 0.0), jnp.asarray(b3, jnp.float32)])
    bn = jnp.concatenate([gammas, betas]).reshape(-1, 1)             # (2*nbn, 1)

    # Boundary-validity masks for the 9 taps, pre-broadcast over bottleneck channels.
    hw = h * w
    f = jnp.arange(hw)
    hh, ww = f // w, f % w
    rows = []
    for dh in (-1, 0, 1):
        for dw in (-1, 0, 1):
            valid = ((hh + dh >= 0) & (hh + dh < h) & (ww + dw >= 0) & (ww + dw < w))
            rows.append(jnp.broadcast_to(valid.astype(jnp.float32), (cm_p, hw)))
    tap_mask = jnp.concatenate(rows, axis=0)                         # (9*cm_p, hw)

    return {"w1": w1, "w2": w2, "w3": w3, "bn": bn, "tap_mask": tap_mask}


@jax.jit
def resblock_forward(x_nchw, prep):
    """ResBlock.forward (train-mode BN) on NCHW input; returns NCHW output."""
    n, cin, h, w = x_nchw.shape
    w1, w2, w3 = prep["w1"], prep["w2"], prep["w3"]
    cout = w3.shape[0]
    assert cout == cin, "residual add requires out_channel == in_channels (stride 1)"
    assert cin % 4 == 0, "ResBlock requires in_channels % 4 == 0"
    assert (h * w) % 128 == 0, "H*W must be a multiple of 128 for lane-dense stores"
    p = h * w

    x_flat = x_nchw.reshape(n, cin, p)            # free reshape (no transpose / HBM copy)

    kernel = functools.partial(_resblock_kernel, n=n, h=h, w=w, eps=_BN_EPS)
    vmem = pl.BlockSpec(memory_space=pltpu.VMEM)
    out_flat = pl.pallas_call(
        kernel,
        out_shape=jax.ShapeDtypeStruct((n, cout, p), jnp.float32),
        in_specs=[vmem] * 6,
        out_specs=vmem,
        compiler_params=pltpu.CompilerParams(vmem_limit_bytes=4 * 1024 * 1024),
    )(x_flat, w1, w2, w3, prep["bn"], prep["tap_mask"])

    return out_flat.reshape(n, cout, h, w)        # free reshape back to NCHW


def _resblock_reference(x, params, *, eps=_BN_EPS):
    """Pure-JAX reference matching the PyTorch ResBlock forward in train() mode."""
    (w1, g1, b1, w2, g2, b2, w3, g3, b3) = params

    def cnn_block(inp, wgt, gamma, beta, pad):
        y = jax.lax.conv_general_dilated(
            inp, wgt, window_strides=(1, 1), padding=[(pad, pad), (pad, pad)],
            dimension_numbers=('NCHW', 'OIHW', 'NCHW'))
        mean = jnp.mean(y, axis=(0, 2, 3), keepdims=True)
        var = jnp.mean((y - mean) ** 2, axis=(0, 2, 3), keepdims=True)
        y = (y - mean) / jnp.sqrt(var + eps)
        y = y * gamma.reshape(1, -1, 1, 1) + beta.reshape(1, -1, 1, 1)
        return jnp.maximum(y, 0.0)

    x1 = cnn_block(x, w1, g1, b1, 0)
    x2 = cnn_block(x1, w2, g2, b2, 1)
    x3 = cnn_block(x2, w3, g3, b3, 0)
    return jnp.maximum(x + x3, 0.0)


if __name__ == "__main__":
    # ResBlock requires in_channels % 4 == 0 and out_channel == in_channels (stride=1)
    # for the residual add to be shape-compatible.
    N, Cin, H, W = 2, 16, 16, 16
    Cout = Cin
    Cm = Cin // 4

    key = jax.random.PRNGKey(0)
    ks = jax.random.split(key, 8)
    x = jax.random.normal(ks[0], (N, Cin, H, W), jnp.float32)

    # PyTorch-shaped parameters (conv weights OIHW; BN gamma/beta per channel).
    # Conv biases are omitted: they cancel exactly under train-mode BatchNorm.
    # TODO(synk): BatchNorm2d running_mean/var buffer updates (a training-time side
    # effect that does not change the train-mode forward output) are not modeled.
    params = (
        0.2 * jax.random.normal(ks[1], (Cm, Cin, 1, 1), jnp.float32),   # convR1 weight
        1.0 + 0.1 * jax.random.normal(ks[2], (Cm,), jnp.float32),       # BN1 gamma
        0.1 * jax.random.normal(ks[3], (Cm,), jnp.float32),             # BN1 beta
        0.2 * jax.random.normal(ks[4], (Cm, Cm, 3, 3), jnp.float32),    # convR2 weight
        jnp.ones((Cm,), jnp.float32),                                   # BN2 gamma
        jnp.zeros((Cm,), jnp.float32),                                  # BN2 beta
        0.2 * jax.random.normal(ks[5], (Cout, Cm, 1, 1), jnp.float32),  # convR3 weight
        1.0 + 0.1 * jax.random.normal(ks[6], (Cout,), jnp.float32),     # BN3 gamma
        0.1 * jax.random.normal(ks[7], (Cout,), jnp.float32),           # BN3 beta
    )

    # One-time parameter preparation (all per-call re-layout hoisted out of the forward).
    prep = prepare_resblock_params(params, H, W)
    jax.block_until_ready(prep)

    out = resblock_forward(x, prep)
    jax.block_until_ready(out)
    assert out.shape == (N, Cout, H, W)

    ref = _resblock_reference(x, params)
    max_err = float(jnp.max(jnp.abs(out - ref)))
    assert jnp.allclose(out, ref, atol=2e-3, rtol=2e-3), max_err

    print("KERNEL_OK")
</pallas_src>

<mosaic_0001>
module attributes {stable_mosaic.version = 11 : i64} {
  func.func @_resblock_kernel(%arg0: memref<2x16x256xf32, #tpu.memory_space<vmem>>, %arg1: memref<8x16xf32, #tpu.memory_space<vmem>>, %arg2: memref<8x72xf32, #tpu.memory_space<vmem>>, %arg3: memref<16x8xf32, #tpu.memory_space<vmem>>, %arg4: memref<64x1xf32, #tpu.memory_space<vmem>>, %arg5: memref<72x256xf32, #tpu.memory_space<vmem>>, %arg6: memref<2x16x256xf32, #tpu.memory_space<vmem>>) attributes {dimension_semantics = [], scalar_prefetch = 0 : i64, scratch_operands = 0 : i64, tpu.core_type = #tpu.core_type<tc>} {
    %c0 = arith.constant 0 : index
    %c0_0 = arith.constant 0 : index
    %c0_1 = arith.constant 0 : index
    %0 = vector.load %arg0[%c0, %c0_0, %c0_1] : memref<2x16x256xf32, #tpu.memory_space<vmem>>, vector<2x16x256xf32>
    %c0_2 = arith.constant 0 : index
    %c0_3 = arith.constant 0 : index
    %1 = vector.load %arg1[%c0_2, %c0_3] : memref<8x16xf32, #tpu.memory_space<vmem>>, vector<8x16xf32>
    %c0_4 = arith.constant 0 : index
    %c0_5 = arith.constant 0 : index
    %2 = vector.load %arg2[%c0_4, %c0_5] : memref<8x72xf32, #tpu.memory_space<vmem>>, vector<8x72xf32>
    %c0_6 = arith.constant 0 : index
    %c0_7 = arith.constant 0 : index
    %3 = vector.load %arg3[%c0_6, %c0_7] : memref<16x8xf32, #tpu.memory_space<vmem>>, vector<16x8xf32>
    %c0_8 = arith.constant 0 : index
    %c0_9 = arith.constant 0 : index
    %4 = vector.load %arg4[%c0_8, %c0_9] : memref<64x1xf32, #tpu.memory_space<vmem>>, vector<64x1xf32>
    %c0_10 = arith.constant 0 : index
    %c0_11 = arith.constant 0 : index
    %5 = vector.load %arg5[%c0_10, %c0_11] : memref<72x256xf32, #tpu.memory_space<vmem>>, vector<72x256xf32>
    %6 = vector.extract_strided_slice %4 {offsets = [0, 0], sizes = [8, 1], strides = [1, 1]} : vector<64x1xf32> to vector<8x1xf32>
    %7 = vector.shape_cast %6 : vector<8x1xf32> to vector<1x8x1xf32>
    %8 = vector.extract_strided_slice %4 {offsets = [32, 0], sizes = [8, 1], strides = [1, 1]} : vector<64x1xf32> to vector<8x1xf32>
    %9 = vector.shape_cast %8 : vector<8x1xf32> to vector<1x8x1xf32>
    %10 = vector.extract_strided_slice %0 {offsets = [0, 0, 0], sizes = [1, 16, 256], strides = [1, 1, 1]} : vector<2x16x256xf32> to vector<1x16x256xf32>
    %11 = vector.shape_cast %10 : vector<1x16x256xf32> to vector<16x256xf32>
    %cst = arith.constant dense<0.000000e+00> : vector<8x256xf32>
    %12 = tpu.matmul %1, %11, %cst {dimension_numbers = #tpu.dot_dimension_numbers<[1], [0], [0], [1], [0, 0, 1, 1], [], []>} : vector<8x16xf32>, vector<16x256xf32>, vector<8x256xf32> -> vector<8x256xf32>
    %13 = vector.extract_strided_slice %0 {offsets = [1, 0, 0], sizes = [1, 16, 256], strides = [1, 1, 1]} : vector<2x16x256xf32> to vector<1x16x256xf32>
    %14 = vector.shape_cast %13 : vector<1x16x256xf32> to vector<16x256xf32>
    %cst_12 = arith.constant dense<0.000000e+00> : vector<8x256xf32>
    %15 = tpu.matmul %1, %14, %cst_12 {dimension_numbers = #tpu.dot_dimension_numbers<[1], [0], [0], [1], [0, 0, 1, 1], [], []>} : vector<8x16xf32>, vector<16x256xf32>, vector<8x256xf32> -> vector<8x256xf32>
    %16 = vector.shape_cast %12 : vector<8x256xf32> to vector<1x8x256xf32>
    %17 = vector.shape_cast %15 : vector<8x256xf32> to vector<1x8x256xf32>
    %18 = tpu.concatenate %16, %17 in 0 : vector<1x8x256xf32>, vector<1x8x256xf32> -> vector<2x8x256xf32>
    %cst_13 = arith.constant dense<0.000000e+00> : vector<8x256xf32>
    %19 = vector.multi_reduction <add>, %18, %cst_13 [0] : vector<2x8x256xf32> to vector<8x256xf32>
    %20 = vector.shape_cast %19 : vector<8x256xf32> to vector<1x8x256xf32>
    %cst_14 = arith.constant dense<0.000000e+00> : vector<1x8xf32>
    %21 = vector.multi_reduction <add>, %20, %cst_14 [2] : vector<1x8x256xf32> to vector<1x8xf32>
    %22 = vector.shape_cast %21 : vector<1x8xf32> to vector<1x8x1xf32>
    %cst_15 = arith.constant 5.120000e+02 : f32
    %23 = vector.broadcast %cst_15 : f32 to vector<1x8x1xf32>
    %24 = arith.divf %22, %23 : vector<1x8x1xf32>
    %25 = arith.mulf %18, %18 : vector<2x8x256xf32>
    %cst_16 = arith.constant dense<0.000000e+00> : vector<8x256xf32>
    %26 = vector.multi_reduction <add>, %25, %cst_16 [0] : vector<2x8x256xf32> to vector<8x256xf32>
    %27 = vector.shape_cast %26 : vector<8x256xf32> to vector<1x8x256xf32>
    %cst_17 = arith.constant dense<0.000000e+00> : vector<1x8xf32>
    %28 = vector.multi_reduction <add>, %27, %cst_17 [2] : vector<1x8x256xf32> to vector<1x8xf32>
    %29 = vector.shape_cast %28 : vector<1x8xf32> to vector<1x8x1xf32>
    %cst_18 = arith.constant 5.120000e+02 : f32
    %30 = vector.broadcast %cst_18 : f32 to vector<1x8x1xf32>
    %31 = arith.divf %29, %30 : vector<1x8x1xf32>
    %32 = arith.mulf %24, %24 : vector<1x8x1xf32>
    %33 = arith.subf %31, %32 : vector<1x8x1xf32>
    %cst_19 = arith.constant 0.000000e+00 : f32
    %34 = vector.broadcast %cst_19 : f32 to vector<1x8x1xf32>
    %35 = arith.maximumf %33, %34 : vector<1x8x1xf32>
    %cst_20 = arith.constant 9.99999974E-6 : f32
    %36 = vector.broadcast %cst_20 : f32 to vector<1x8x1xf32>
    %37 = arith.addf %35, %36 : vector<1x8x1xf32>
    %38 = math.rsqrt %37 : vector<1x8x1xf32>
    %39 = arith.mulf %7, %38 : vector<1x8x1xf32>
    %40 = arith.mulf %24, %39 : vector<1x8x1xf32>
    %41 = arith.subf %9, %40 : vector<1x8x1xf32>
    %42 = vector.broadcast %39 : vector<1x8x1xf32> to vector<2x8x256xf32>
    %43 = arith.mulf %18, %42 : vector<2x8x256xf32>
    %44 = vector.broadcast %41 : vector<1x8x1xf32> to vector<2x8x256xf32>
    %45 = arith.addf %43, %44 : vector<2x8x256xf32>
    %cst_21 = arith.constant 0.000000e+00 : f32
    %46 = vector.broadcast %cst_21 : f32 to vector<2x8x256xf32>
    %47 = arith.maximumf %45, %46 : vector<2x8x256xf32>
    %48 = vector.extract_strided_slice %47 {offsets = [0, 0, 0], sizes = [1, 8, 256], strides = [1, 1, 1]} : vector<2x8x256xf32> to vector<1x8x256xf32>
    %49 = vector.shape_cast %48 : vector<1x8x256xf32> to vector<8x256xf32>
    %c17_i32 = arith.constant 17 : i32
    %50 = tpu.dynamic_rotate %49 by %c17_i32 dim 1 : vector<8x256xf32>, i32 -> vector<8x256xf32>
    %c16_i32 = arith.constant 16 : i32
    %51 = tpu.dynamic_rotate %49 by %c16_i32 dim 1 : vector<8x256xf32>, i32 -> vector<8x256xf32>
    %c15_i32 = arith.constant 15 : i32
    %52 = tpu.dynamic_rotate %49 by %c15_i32 dim 1 : vector<8x256xf32>, i32 -> vector<8x256xf32>
    %c1_i32 = arith.constant 1 : i32
    %53 = tpu.dynamic_rotate %49 by %c1_i32 dim 1 : vector<8x256xf32>, i32 -> vector<8x256xf32>
    %c255_i32 = arith.constant 255 : i32
    %54 = tpu.dynamic_rotate %49 by %c255_i32 dim 1 : vector<8x256xf32>, i32 -> vector<8x256xf32>
    %c241_i32 = arith.constant 241 : i32
    %55 = tpu.dynamic_rotate %49 by %c241_i32 dim 1 : vector<8x256xf32>, i32 -> vector<8x256xf32>
    %c240_i32 = arith.constant 240 : i32
    %56 = tpu.dynamic_rotate %49 by %c240_i32 dim 1 : vector<8x256xf32>, i32 -> vector<8x256xf32>
    %c239_i32 = arith.constant 239 : i32
    %57 = tpu.dynamic_rotate %49 by %c239_i32 dim 1 : vector<8x256xf32>, i32 -> vector<8x256xf32>
    %58 = tpu.concatenate %50, %51, %52, %53, %49, %54, %55, %56, %57 in 0 : vector<8x256xf32>, vector<8x256xf32>, vector<8x256xf32>, vector<8x256xf32>, vector<8x256xf32>, vector<8x256xf32>, vector<8x256xf32>, vector<8x256xf32>, vector<8x256xf32> -> vector<72x256xf32>
    %59 = arith.mulf %58, %5 : vector<72x256xf32>
    %cst_22 = arith.constant dense<0.000000e+00> : vector<8x256xf32>
    %60 = tpu.matmul %2, %59, %cst_22 {dimension_numbers = #tpu.dot_dimension_numbers<[1], [0], [0], [1], [0, 0, 1, 1], [], []>} : vector<8x72xf32>, vector<72x256xf32>, vector<8x256xf32> -> vector<8x256xf32>
    %61 = vector.extract_strided_slice %47 {offsets = [1, 0, 0], sizes = [1, 8, 256], strides = [1, 1, 1]} : vector<2x8x256xf32> to vector<1x8x256xf32>
    %62 = vector.shape_cast %61 : vector<1x8x256xf32> to vector<8x256xf32>
    %c17_i32_23 = arith.constant 17 : i32
    %63 = tpu.dynamic_rotate %62 by %c17_i32_23 dim 1 : vector<8x256xf32>, i32 -> vector<8x256xf32>
    %c16_i32_24 = arith.constant 16 : i32
    %64 = tpu.dynamic_rotate %62 by %c16_i32_24 dim 1 : vector<8x256xf32>, i32 -> vector<8x256xf32>
    %c15_i32_25 = arith.constant 15 : i32
    %65 = tpu.dynamic_rotate %62 by %c15_i32_25 dim 1 : vector<8x256xf32>, i32 -> vector<8x256xf32>
    %c1_i32_26 = arith.constant 1 : i32
    %66 = tpu.dynamic_rotate %62 by %c1_i32_26 dim 1 : vector<8x256xf32>, i32 -> vector<8x256xf32>
    %c255_i32_27 = arith.constant 255 : i32
    %67 = tpu.dynamic_rotate %62 by %c255_i32_27 dim 1 : vector<8x256xf32>, i32 -> vector<8x256xf32>
    %c241_i32_28 = arith.constant 241 : i32
    %68 = tpu.dynamic_rotate %62 by %c241_i32_28 dim 1 : vector<8x256xf32>, i32 -> vector<8x256xf32>
    %c240_i32_29 = arith.constant 240 : i32
    %69 = tpu.dynamic_rotate %62 by %c240_i32_29 dim 1 : vector<8x256xf32>, i32 -> vector<8x256xf32>
    %c239_i32_30 = arith.constant 239 : i32
    %70 = tpu.dynamic_rotate %62 by %c239_i32_30 dim 1 : vector<8x256xf32>, i32 -> vector<8x256xf32>
    %71 = tpu.concatenate %63, %64, %65, %66, %62, %67, %68, %69, %70 in 0 : vector<8x256xf32>, vector<8x256xf32>, vector<8x256xf32>, vector<8x256xf32>, vector<8x256xf32>, vector<8x256xf32>, vector<8x256xf32>, vector<8x256xf32>, vector<8x256xf32> -> vector<72x256xf32>
    %72 = arith.mulf %71, %5 : vector<72x256xf32>
    %cst_31 = arith.constant dense<0.000000e+00> : vector<8x256xf32>
    %73 = tpu.matmul %2, %72, %cst_31 {dimension_numbers = #tpu.dot_dimension_numbers<[1], [0], [0], [1], [0, 0, 1, 1], [], []>} : vector<8x72xf32>, vector<72x256xf32>, vector<8x256xf32> -> vector<8x256xf32>
    %74 = vector.shape_cast %60 : vector<8x256xf32> to vector<1x8x256xf32>
    %75 = vector.shape_cast %73 : vector<8x256xf32> to vector<1x8x256xf32>
    %76 = tpu.concatenate %74, %75 in 0 : vector<1x8x256xf32>, vector<1x8x256xf32> -> vector<2x8x256xf32>
    %77 = vector.extract_strided_slice %4 {offsets = [8, 0], sizes = [8, 1], strides = [1, 1]} : vector<64x1xf32> to vector<8x1xf32>
    %78 = vector.shape_cast %77 : vector<8x1xf32> to vector<1x8x1xf32>
    %79 = vector.extract_strided_slice %4 {offsets = [40, 0], sizes = [8, 1], strides = [1, 1]} : vector<64x1xf32> to vector<8x1xf32>
    %80 = vector.shape_cast %79 : vector<8x1xf32> to vector<1x8x1xf32>
    %cst_32 = arith.constant dense<0.000000e+00> : vector<8x256xf32>
    %81 = vector.multi_reduction <add>, %76, %cst_32 [0] : vector<2x8x256xf32> to vector<8x256xf32>
    %82 = vector.shape_cast %81 : vector<8x256xf32> to vector<1x8x256xf32>
    %cst_33 = arith.constant dense<0.000000e+00> : vector<1x8xf32>
    %83 = vector.multi_reduction <add>, %82, %cst_33 [2] : vector<1x8x256xf32> to vector<1x8xf32>
    %84 = vector.shape_cast %83 : vector<1x8xf32> to vector<1x8x1xf32>
    %cst_34 = arith.constant 5.120000e+02 : f32
    %85 = vector.broadcast %cst_34 : f32 to vector<1x8x1xf32>
    %86 = arith.divf %84, %85 : vector<1x8x1xf32>
    %87 = arith.mulf %76, %76 : vector<2x8x256xf32>
    %cst_35 = arith.constant dense<0.000000e+00> : vector<8x256xf32>
    %88 = vector.multi_reduction <add>, %87, %cst_35 [0] : vector<2x8x256xf32> to vector<8x256xf32>
    %89 = vector.shape_cast %88 : vector<8x256xf32> to vector<1x8x256xf32>
    %cst_36 = arith.constant dense<0.000000e+00> : vector<1x8xf32>
    %90 = vector.multi_reduction <add>, %89, %cst_36 [2] : vector<1x8x256xf32> to vector<1x8xf32>
    %91 = vector.shape_cast %90 : vector<1x8xf32> to vector<1x8x1xf32>
    %cst_37 = arith.constant 5.120000e+02 : f32
    %92 = vector.broadcast %cst_37 : f32 to vector<1x8x1xf32>
    %93 = arith.divf %91, %92 : vector<1x8x1xf32>
    %94 = arith.mulf %86, %86 : vector<1x8x1xf32>
    %95 = arith.subf %93, %94 : vector<1x8x1xf32>
    %cst_38 = arith.constant 0.000000e+00 : f32
    %96 = vector.broadcast %cst_38 : f32 to vector<1x8x1xf32>
    %97 = arith.maximumf %95, %96 : vector<1x8x1xf32>
    %cst_39 = arith.constant 9.99999974E-6 : f32
    %98 = vector.broadcast %cst_39 : f32 to vector<1x8x1xf32>
    %99 = arith.addf %97, %98 : vector<1x8x1xf32>
    %100 = math.rsqrt %99 : vector<1x8x1xf32>
    %101 = arith.mulf %78, %100 : vector<1x8x1xf32>
    %102 = arith.mulf %86, %101 : vector<1x8x1xf32>
    %103 = arith.subf %80, %102 : vector<1x8x1xf32>
    %104 = vector.broadcast %101 : vector<1x8x1xf32> to vector<2x8x256xf32>
    %105 = arith.mulf %76, %104 : vector<2x8x256xf32>
    %106 = vector.broadcast %103 : vector<1x8x1xf32> to vector<2x8x256xf32>
    %107 = arith.addf %105, %106 : vector<2x8x256xf32>
    %cst_40 = arith.constant 0.000000e+00 : f32
    %108 = vector.broadcast %cst_40 : f32 to vector<2x8x256xf32>
    %109 = arith.maximumf %107, %108 : vector<2x8x256xf32>
    %110 = vector.extract_strided_slice %4 {offsets = [16, 0], sizes = [16, 1], strides = [1, 1]} : vector<64x1xf32> to vector<16x1xf32>
    %111 = vector.shape_cast %110 : vector<16x1xf32> to vector<1x16x1xf32>
    %112 = vector.extract_strided_slice %4 {offsets = [48, 0], sizes = [16, 1], strides = [1, 1]} : vector<64x1xf32> to vector<16x1xf32>
    %113 = vector.shape_cast %112 : vector<16x1xf32> to vector<1x16x1xf32>
    %114 = vector.extract_strided_slice %109 {offsets = [0, 0, 0], sizes = [1, 8, 256], strides = [1, 1, 1]} : vector<2x8x256xf32> to vector<1x8x256xf32>
    %115 = vector.shape_cast %114 : vector<1x8x256xf32> to vector<8x256xf32>
    %cst_41 = arith.constant dense<0.000000e+00> : vector<16x256xf32>
    %116 = tpu.matmul %3, %115, %cst_41 {dimension_numbers = #tpu.dot_dimension_numbers<[1], [0], [0], [1], [0, 0, 1, 1], [], []>} : vector<16x8xf32>, vector<8x256xf32>, vector<16x256xf32> -> vector<16x256xf32>
    %117 = vector.extract_strided_slice %109 {offsets = [1, 0, 0], sizes = [1, 8, 256], strides = [1, 1, 1]} : vector<2x8x256xf32> to vector<1x8x256xf32>
    %118 = vector.shape_cast %117 : vector<1x8x256xf32> to vector<8x256xf32>
    %cst_42 = arith.constant dense<0.000000e+00> : vector<16x256xf32>
    %119 = tpu.matmul %3, %118, %cst_42 {dimension_numbers = #tpu.dot_dimension_numbers<[1], [0], [0], [1], [0, 0, 1, 1], [], []>} : vector<16x8xf32>, vector<8x256xf32>, vector<16x256xf32> -> vector<16x256xf32>
    %120 = vector.shape_cast %116 : vector<16x256xf32> to vector<1x16x256xf32>
    %121 = vector.shape_cast %119 : vector<16x256xf32> to vector<1x16x256xf32>
    %122 = tpu.concatenate %120, %121 in 0 : vector<1x16x256xf32>, vector<1x16x256xf32> -> vector<2x16x256xf32>
    %cst_43 = arith.constant dense<0.000000e+00> : vector<16x256xf32>
    %123 = vector.multi_reduction <add>, %122, %cst_43 [0] : vector<2x16x256xf32> to vector<16x256xf32>
    %124 = vector.shape_cast %123 : vector<16x256xf32> to vector<1x16x256xf32>
    %cst_44 = arith.constant dense<0.000000e+00> : vector<1x16xf32>
    %125 = vector.multi_reduction <add>, %124, %cst_44 [2] : vector<1x16x256xf32> to vector<1x16xf32>
    %126 = vector.shape_cast %125 : vector<1x16xf32> to vector<1x16x1xf32>
    %cst_45 = arith.constant 5.120000e+02 : f32
    %127 = vector.broadcast %cst_45 : f32 to vector<1x16x1xf32>
    %128 = arith.divf %126, %127 : vector<1x16x1xf32>
    %129 = arith.mulf %122, %122 : vector<2x16x256xf32>
    %cst_46 = arith.constant dense<0.000000e+00> : vector<16x256xf32>
    %130 = vector.multi_reduction <add>, %129, %cst_46 [0] : vector<2x16x256xf32> to vector<16x256xf32>
    %131 = vector.shape_cast %130 : vector<16x256xf32> to vector<1x16x256xf32>
    %cst_47 = arith.constant dense<0.000000e+00> : vector<1x16xf32>
    %132 = vector.multi_reduction <add>, %131, %cst_47 [2] : vector<1x16x256xf32> to vector<1x16xf32>
    %133 = vector.shape_cast %132 : vector<1x16xf32> to vector<1x16x1xf32>
    %cst_48 = arith.constant 5.120000e+02 : f32
    %134 = vector.broadcast %cst_48 : f32 to vector<1x16x1xf32>
    %135 = arith.divf %133, %134 : vector<1x16x1xf32>
    %136 = arith.mulf %128, %128 : vector<1x16x1xf32>
    %137 = arith.subf %135, %136 : vector<1x16x1xf32>
    %cst_49 = arith.constant 0.000000e+00 : f32
    %138 = vector.broadcast %cst_49 : f32 to vector<1x16x1xf32>
    %139 = arith.maximumf %137, %138 : vector<1x16x1xf32>
    %cst_50 = arith.constant 9.99999974E-6 : f32
    %140 = vector.broadcast %cst_50 : f32 to vector<1x16x1xf32>
    %141 = arith.addf %139, %140 : vector<1x16x1xf32>
    %142 = math.rsqrt %141 : vector<1x16x1xf32>
    %143 = arith.mulf %111, %142 : vector<1x16x1xf32>
    %144 = arith.mulf %128, %143 : vector<1x16x1xf32>
    %145 = arith.subf %113, %144 : vector<1x16x1xf32>
    %146 = vector.broadcast %143 : vector<1x16x1xf32> to vector<2x16x256xf32>
    %147 = arith.mulf %122, %146 : vector<2x16x256xf32>
    %148 = vector.broadcast %145 : vector<1x16x1xf32> to vector<2x16x256xf32>
    %149 = arith.addf %147, %148 : vector<2x16x256xf32>
    %cst_51 = arith.constant 0.000000e+00 : f32
    %150 = vector.broadcast %cst_51 : f32 to vector<2x16x256xf32>
    %151 = arith.maximumf %149, %150 : vector<2x16x256xf32>
    %152 = arith.addf %0, %151 : vector<2x16x256xf32>
    %cst_52 = arith.constant 0.000000e+00 : f32
    %153 = vector.broadcast %cst_52 : f32 to vector<2x16x256xf32>
    %154 = arith.maximumf %152, %153 : vector<2x16x256xf32>
    %c0_53 = arith.constant 0 : index
    %c0_54 = arith.constant 0 : index
    %c0_55 = arith.constant 0 : index
    %155 = vector.load %arg6[%c0_53, %c0_54, %c0_55] : memref<2x16x256xf32, #tpu.memory_space<vmem>>, vector<2x16x256xf32>
    tpu.vector_store %arg6[%c0_53, %c0_54, %c0_55], %154 {strides = array<i32>} : memref<2x16x256xf32, #tpu.memory_space<vmem>>, vector<2x16x256xf32>,
    return
  }
}

</mosaic_0001>

<bundles_post_ra>
// kernel: resblock_forward.1
= control target key start
LH: loop header
LB: loop body
LE: loop exit
PB: predicated region body
PF: predicated region fallthrough
CT: control target
= control target key end

     0   :  { %vm61_vm0 = vcmask 130048   ;;  %v764_v23 = vmov 512.0   ;;  %v765_v27 = vmov 0   ;;  %s766_s17 = smov 112   ;;  %s767_s18 = smov 111   ;;  %vm283_vm13 = vcmask 588800   ;;  %s1183_s0 = inlined_call_operand.vmem [shape: f32[2,16,256], index: 0, kind: input, shape index: {}]   ;;  %s1184_s1 = inlined_call_operand.vmem [shape: f32[8,16], index: 1, kind: input, shape index: {}]   ;;  %s1185_s4 = inlined_call_operand.vmem [shape: f32[64,1], index: 4, kind: input, shape index: {}]   ;;  %s1186_s5 = inlined_call_operand.vmem [shape: f32[72,256], index: 5, kind: input, shape index: {}]   ;;  %s1187_s2 = inlined_call_operand.vmem [shape: f32[8,72], index: 2, kind: input, shape index: {}]   ;;  %s1188_s3 = inlined_call_operand.vmem [shape: f32[16,8], index: 3, kind: input, shape index: {}]   ;;  %s1189_s6 = inlined_call_operand.vmem [shape: f32[2,16,256], index: 6, kind: output, shape index: {}]  }
   0x1   :  { %v812_v0 = vld [vmem:[%s1183_s0 + $0x30] sm:$0xff]  ;;  %v817_v1 = vld [vmem:[%s1183_s0 + $0x38] sm:$0xff]  ;;  %v822_v2 = vld [vmem:[%s1183_s0 + $0x20] sm:$0xff]  ;;  %754 = vrcp.f32 %v764_v23  ;;  %751 = vset.pattern.permute.xlu1 %v765_v27  ;;  %752 = vset.pattern.permute.xlu0 %v765_v27  ;;  %s768_s19 = smov 113   ;;  %s769_s20 = smov 127  }
   0x2   :  { %119 = vmatpush.msra.mxu2 %v812_v0  ;;  %139 = vmatpush.msra.mxu3 %v817_v1  ;;  %v829_v3 = vld [vmem:[%s1183_s0 + $0x28] sm:$0xff]  ;;  %v31_v4 = vld [vmem:[%s1184_s1] sm:$0xff]  ;;  %v837_v5 = vld [vmem:[%s1183_s0 + $0x10] sm:$0xff]  ;;  %s770_s21 = smov 1   ;;  %s771_s22 = smov 15  }
   0x3   :  { %79 = vmatpush.msra.mxu0 %v837_v5  ;;  %v843_v6 = vld [vmem:[%s1183_s0 + $0x18] sm:$0xff]  ;;  %v848_v7 = vld [vmem:[%s1183_s0] sm:$0xff]  ;;  %v855_v8 = vld [vmem:[%s1183_s0 + $0x8] sm:$0xff]  ;;  %753 = vset.pattern.permute.xlu2 %v765_v27  ;;  %s772_s23 = smov 16   ;;  %s773_s24 = smov 17  }
   0x4   :  { %120 = vmatpush.msra.mxu2 %v822_v2  ;;  %140 = vmatpush.msra.mxu3 %v829_v3  ;;  %v35_v44 = vld [vmem:[%s1185_s4] sm:$0xff] }
   0x5   :  { %727 = vmatmul.msk.f32.vlgmr.msra.gmra.mxu2 %vm61_vm0, %v31_v4  ;;  %728 = vmatmul.msk.f32.vlgmr.msra.gmra.mxu3 %vm61_vm0, %v31_v4  ;;  %v39_v49 = vld [vmem:[%s1185_s4 + $0x20] sm:$0xff] }
   0x6   :  { %99 = vmatpush.msra.mxu1 %v843_v6  ;;  %80 = vmatpush.msra.mxu0 %v848_v7 }
   0x7   :  { %725 = vmatmul.msk.f32.vlgmr.msra.gmra.mxu0 %vm61_vm0, %v31_v4  ;;  %v755_v24 = vpop.eup %754 }
   0x8   :  { %100 = vmatpush.msra.mxu1 %v855_v8  ;;  %v151_v25 = vmul.f32 512.0, %v755_v24  ;;  %vm155_vm1 = vweird.f32 %v755_v24 }
   0x9   :  { %726 = vmatmul.msk.f32.vlgmr.msra.gmra.mxu1 %vm61_vm0, %v31_v4 }
   0xa   :  { %v152_v26 = vsub.f32 1.0, %v151_v25 }
   0xc   :  { %v153_v28 = vmul.f32 %v755_v24, %v152_v26 }
   0xe   :  { %v154_v29 = vadd.f32 %v755_v24, %v153_v28 }
  0x10   :  { %v870_v31 = vsel %vm155_vm1, %v755_v24, %v154_v29  ;;  %v55_v29 = vld [vmem:[%s1186_s5 + $0x60] sm:$0xff]  ;;  %vm488_vm1 = vcmask 64512  }
  0x84   :  { %v860_v9 = vpop.f32.mrf.mxu0 }
  0x85   :  { %v158_v15 = vmul.f32 %v860_v9, %v860_v9 }
  0x86   :  { %v862_v10 = vpop.f32.mrf.mxu1 }
  0x87   :  { %v159_v16 = vmul.f32 %v862_v10, %v862_v10 }
  0x88   :  { %v122_v11 = vpop.f32.mrf.mxu2  ;;  %v142_v12 = vpop.f32.mrf.mxu3 }
  0x89   :  { %v145_v13 = vadd.f32 %v122_v11, %v860_v9  ;;  %v146_v14 = vadd.f32 %v142_v12, %v862_v10  ;;  %v160_v17 = vmul.f32 %v122_v11, %v122_v11  ;;  %v161_v18 = vmul.f32 %v142_v12, %v142_v12 }
  0x8b   :  { %v147_v19 = vadd.f32 %v146_v14, %v145_v13  ;;  %v162_v20 = vadd.f32 %v160_v17, %v158_v15  ;;  %v163_v21 = vadd.f32 %v161_v18, %v159_v16  ;;  %v60_v13 = vld [vmem:[%s1186_s5 + $0x88] sm:$0xff] }
  0x8d   :  { %148 = vadd.xlane.f32.xlu0 %v147_v19  ;;  %v164_v22 = vadd.f32 %v163_v21, %v162_v20  ;;  %v57_v20 = vld [vmem:[%s1186_s5 + $0x70] sm:$0xff]  ;;  %v58_v21 = vld [vmem:[%s1186_s5 + $0x78] sm:$0xff] }
  0x95   :  { %165 = vadd.xlane.f32.xlu0 %v164_v22 }
 0x100   :  { %v149_v30 = vpop.xlane.xlu0 %148 }
 0x101   :  { %v157_v32 = vmul.f32 %v870_v31, %v149_v30  ;;  %v56_v30 = vld [vmem:[%s1186_s5 + $0x68] sm:$0xff] }
 0x103   :  { %v168_v34 = vmul.f32 %v157_v32, %v157_v32 }
 0x108   :  { %v166_v33 = vpop.xlane.xlu0 %165 }
 0x109   :  { %v167_v35 = vmul.f32 %v166_v33, %v870_v31 }
 0x10b   :  { %v169_v36 = vsub.f32 %v167_v35, %v168_v34 }
 0x10d   :  { %v170_v37 = vmax.f32 %v169_v36, 0.0 }
 0x10f   :  { %v171_v38 = vadd.f32 1e-05, %v170_v37  ;;  %v53_v37 = vld [vmem:[%s1186_s5 + $0x50] sm:$0xff] }
 0x111   :  { %756 = vrsqrt.f32 %v171_v38  ;;  %vm178_vm3 = vweird.f32 %v171_v38 }
 0x117   :  { %v757_v39 = vpop.eup %756 }
 0x118   :  { %v173_v40 = vmul.f32 %v757_v39, %v171_v38  ;;  %vm179_vm2 = vweird.f32 %v757_v39  ;;  %v54_v38 = vld [vmem:[%s1186_s5 + $0x58] sm:$0xff] }
 0x119   :  { %vm180_vm4 = vmor %vm178_vm3, %vm179_vm2 }
 0x11a   :  { %v174_v41 = vmul.f32 %v757_v39, %v173_v40 }
 0x11c   :  { %v175_v42 = vmul.f32 0.5, %v174_v41 }
 0x11e   :  { %v176_v43 = vsub.f32 1.5, %v175_v42 }
 0x120   :  { %v177_v45 = vmul.f32 %v757_v39, %v176_v43  ;;  %v51_v43 = vld [vmem:[%s1186_s5 + $0x40] sm:$0xff] }
 0x122   :  { %v181_v46 = vsel %vm180_vm4, %v757_v39, %v177_v45 }
 0x123   :  { %v182_v47 = vmul.f32 %v181_v46, %v35_v44  ;;  %v52_v44 = vld [vmem:[%s1186_s5 + $0x48] sm:$0xff] }
 0x125   :  { %187 = vperm.xlu1 %751, %v182_v47   ;;  %v183_v48 = vmul.f32 %v182_v47, %v157_v32 }
 0x127   :  { %v184_v50 = vsub.f32 %v39_v49, %v183_v48 }
 0x12d   :  { %196 = vperm.xlu1 %751, %v184_v50  }
 0x197   :  { %v188_v51 = vpop.permute.xlu1 %187 }
 0x198   :  { %v192_v52 = vmul.f32 %v188_v51, %v122_v11  ;;  %v193_v53 = vmul.f32 %v188_v51, %v142_v12  ;;  %v190_v59 = vmul.f32 %v188_v51, %v860_v9  ;;  %v191_v60 = vmul.f32 %v188_v51, %v862_v10  ;;  %v59_v12 = vld [vmem:[%s1186_s5 + $0x80] sm:$0xff] }
 0x199   :  { %v211_v9 = vlaneseq }
 0x19b   :  { %v926_v11 = vand.u32 127, %v211_v9 }
 0x19d   :  { %vm262_vm5 = vcmp.lt.s32.totalorder %v926_v11, 111  ;;  %vm255_vm6 = vcmp.lt.s32.totalorder %v926_v11, 112  ;;  %vm248_vm7 = vcmp.lt.s32.totalorder %v926_v11, 113  ;;  %vm241_vm8 = vcmp.lt.s32.totalorder %v926_v11, 127 }
 0x19e   :  { %vm234_vm9 = vcmp.lt.s32.totalorder %v926_v11, 1  ;;  %vm220_vm10 = vcmp.lt.s32.totalorder %v926_v11, 16  ;;  %vm227_vm11 = vcmp.lt.s32.totalorder %v926_v11, 15  ;;  %vm213_vm12 = vcmp.lt.s32.totalorder %v926_v11, 17 }
 0x19f   :  { %v197_v54 = vpop.permute.xlu1 %196 }
 0x1a0   :  { %v201_v55 = vadd.f32 %v197_v54, %v192_v52  ;;  %v202_v56 = vadd.f32 %v197_v54, %v193_v53  ;;  %v199_v61 = vadd.f32 %v197_v54, %v190_v59  ;;  %v200_v62 = vadd.f32 %v197_v54, %v191_v60  ;;  %v993_v59 = vld [vmem:[%s1186_s5 + $0x38] sm:$0xff] }
 0x1a2   :  { %v880_v57 = vmax.f32 %v201_v55, 0.0  ;;  %v882_v58 = vmax.f32 %v202_v56, 0.0  ;;  %v894_v63 = vmax.f32 %v199_v61, 0.0  ;;  %v896_v4 = vmax.f32 %v200_v62, 0.0 }
 0x1a4   :  { %365 = vrot.lane.b32.xlu1 %v882_v58, %s766_s17  ;;  %363 = vrot.lane.b32.xlu0 %v880_v57, %s766_s17  ;;  %v383_v47 = vmul.f32 %v880_v57, %v51_v43  ;;  %v384_v48 = vmul.f32 %v882_v58, %v52_v44 }
 0x1a5   :  { %369 = vrot.lane.b32.xlu2 %v880_v57, %s767_s18 }
 0x1ac   :  { %359 = vrot.lane.b32.xlu1 %v882_v58, %s768_s19  ;;  %353 = vrot.lane.b32.xlu0 %v882_v58, %s769_s20 }
 0x1ad   :  { %371 = vrot.lane.b32.xlu2 %v882_v58, %s767_s18 }
 0x1b4   :  { %260 = vrot.lane.b32.xlu1 %v896_v4, %s767_s18  ;;  %244 = vrot.lane.b32.xlu0 %v894_v63, %s768_s19 }
 0x1b5   :  { %357 = vrot.lane.b32.xlu2 %v880_v57, %s768_s19 }
 0x1bc   :  { %347 = vrot.lane.b32.xlu0 %v882_v58, %s770_s21  ;;  %251 = vrot.lane.b32.xlu1 %v894_v63, %s766_s17 }
 0x1bd   :  { %258 = vrot.lane.b32.xlu2 %v894_v63, %s767_s18 }
 0x1c4   :  { %339 = vrot.lane.b32.xlu0 %v880_v57, %s771_s22  ;;  %246 = vrot.lane.b32.xlu1 %v896_v4, %s768_s19 }
 0x1c5   :  { %351 = vrot.lane.b32.xlu2 %v880_v57, %s769_s20 }
 0x1cc   :  { %335 = vrot.lane.b32.xlu0 %v882_v58, %s772_s23  ;;  %237 = vrot.lane.b32.xlu1 %v894_v63, %s769_s20 }
 0x1cd   :  { %253 = vrot.lane.b32.xlu2 %v896_v4, %s766_s17 }
 0x1d4   :  { %327 = vrot.lane.b32.xlu0 %v880_v57, %s773_s24  ;;  %341 = vrot.lane.b32.xlu1 %v882_v58, %s771_s22 }
 0x1d5   :  { %345 = vrot.lane.b32.xlu2 %v880_v57, %s770_s21 }
 0x1dc   :  { %225 = vrot.lane.b32.xlu0 %v896_v4, %s771_s22  ;;  %230 = vrot.lane.b32.xlu1 %v894_v63, %s770_s21 }
 0x1dd   :  { %239 = vrot.lane.b32.xlu2 %v896_v4, %s769_s20 }
 0x1e4   :  { %207 = vrot.lane.b32.xlu0 %v894_v63, %s773_s24  ;;  %329 = vrot.lane.b32.xlu1 %v882_v58, %s773_s24  ;;  %v988_v58 = vld [vmem:[%s1186_s5 + $0x30] sm:$0xff] }
 0x1e5   :  { %333 = vrot.lane.b32.xlu2 %v880_v57, %s772_s23 }
 0x1ec   :  { %216 = vrot.lane.b32.xlu1 %v894_v63, %s772_s23 }
 0x1ed   :  { %232 = vrot.lane.b32.xlu2 %v896_v4, %s770_s21 }
 0x1f4   :  { %209 = vrot.lane.b32.xlu1 %v896_v4, %s773_s24 }
 0x1f5   :  { %223 = vrot.lane.b32.xlu2 %v894_v63, %s771_s22 }
 0x1fd   :  { %218 = vrot.lane.b32.xlu2 %v896_v4, %s772_s23 }
 0x1ff   :  { %v370_v10 = vpop.permute.xlu2 %369 }
 0x207   :  { %v372_v14 = vpop.permute.xlu2 %371 }
 0x208   :  { %v373_v15 = vsel %vm262_vm5, %v370_v10, %v372_v14  ;;  %v374_v16 = vsel %vm262_vm5, %v372_v14, %v370_v10 }
 0x209   :  { %v391_v17 = vmul.f32 %v373_v15, %v59_v12  ;;  %v392_v18 = vmul.f32 %v374_v16, %v60_v13 }
 0x20b   :  { %400 = vmatpush.msrb.mxu2 %v391_v17  ;;  %420 = vmatpush.msrb.mxu3 %v392_v18 }
 0x20f   :  { %v358_v19 = vpop.permute.xlu2 %357 }
 0x216   :  { %v366_v22 = vpop.permute.xlu1 %365  ;;  %v364_v23 = vpop.permute.xlu0 %363 }
 0x217   :  { %v367_v24 = vsel %vm255_vm6, %v364_v23, %v366_v22  ;;  %v368_v25 = vsel %vm255_vm6, %v366_v22, %v364_v23  ;;  %v259_v26 = vpop.permute.xlu2 %258 }
 0x218   :  { %v389_v27 = vmul.f32 %v367_v24, %v57_v20  ;;  %v390_v28 = vmul.f32 %v368_v25, %v58_v21 }
 0x21a   :  { %401 = vmatpush.msrb.mxu2 %v389_v27  ;;  %421 = vmatpush.msrb.mxu3 %v390_v28 }
 0x21e   :  { %v360_v32 = vpop.permute.xlu1 %359  ;;  %v354_v33 = vpop.permute.xlu0 %353 }
 0x21f   :  { %v361_v34 = vsel %vm248_vm7, %v358_v19, %v360_v32  ;;  %v362_v35 = vsel %vm248_vm7, %v360_v32, %v358_v19  ;;  %v352_v36 = vpop.permute.xlu2 %351 }
 0x220   :  { %v355_v39 = vsel %vm241_vm8, %v352_v36, %v354_v33  ;;  %v356_v40 = vsel %vm241_vm8, %v354_v33, %v352_v36  ;;  %v387_v41 = vmul.f32 %v361_v34, %v55_v29  ;;  %v388_v42 = vmul.f32 %v362_v35, %v56_v30  ;;  %v48_v34 = vld [vmem:[%s1186_s5 + $0x28] sm:$0xff] }
 0x221   :  { %v385_v45 = vmul.f32 %v355_v39, %v53_v37  ;;  %v386_v46 = vmul.f32 %v356_v40, %v54_v38  ;;  %v273_v33 = vmul.f32 %v894_v63, %v51_v43  ;;  %v45_v40 = vld [vmem:[%s1186_s5 + $0x10] sm:$0xff] }
 0x222   :  { %402 = vmatpush.msrb.mxu2 %v387_v41  ;;  %422 = vmatpush.msrb.mxu3 %v388_v42  ;;  %v46_v41 = vld [vmem:[%s1186_s5 + $0x18] sm:$0xff] }
 0x224   :  { %403 = vmatpush.msrb.mxu2 %v385_v45  ;;  %423 = vmatpush.msrb.mxu3 %v386_v46 }
 0x226   :  { %v261_v49 = vpop.permute.xlu1 %260  ;;  %v245_v50 = vpop.permute.xlu0 %244  ;;  %404 = vmatpush.msrb.mxu2 %v383_v47  ;;  %424 = vmatpush.msrb.mxu3 %v384_v48 }
 0x227   :  { %v263_v51 = vsel %vm262_vm5, %v259_v26, %v261_v49  ;;  %v264_v52 = vsel %vm262_vm5, %v261_v49, %v259_v26  ;;  %v254_v53 = vpop.permute.xlu2 %253 }
 0x228   :  { %v281_v54 = vmul.f32 %v263_v51, %v59_v12  ;;  %v282_v55 = vmul.f32 %v264_v52, %v60_v13 }
 0x22a   :  { %294 = vmatpush.msrb.mxu0 %v281_v54  ;;  %314 = vmatpush.msrb.mxu1 %v282_v55 }
 0x22e   :  { %v348_v56 = vpop.permute.xlu0 %347  ;;  %v252_v57 = vpop.permute.xlu1 %251 }
 0x22f   :  { %v256_v60 = vsel %vm255_vm6, %v252_v57, %v254_v53  ;;  %v257_v61 = vsel %vm255_vm6, %v254_v53, %v252_v57  ;;  %v346_v62 = vpop.permute.xlu2 %345  ;;  %v43_v57 = vld [vmem:[%s1186_s5] sm:$0xff] }
 0x230   :  { %v349_v9 = vsel %vm234_vm9, %v346_v62, %v348_v56  ;;  %v350_v10 = vsel %vm234_vm9, %v348_v56, %v346_v62  ;;  %v279_v12 = vmul.f32 %v256_v60, %v57_v20  ;;  %v280_v13 = vmul.f32 %v257_v61, %v58_v21  ;;  %v44_v60 = vld [vmem:[%s1186_s5 + $0x8] sm:$0xff] }
 0x231   :  { %v381_v14 = vmul.f32 %v350_v10, %v988_v58  ;;  %v382_v15 = vmul.f32 %v349_v9, %v993_v59  ;;  %v32_v10 = vld [vmem:[%s1187_s2] sm:$0xff] }
 0x232   :  { %295 = vmatpush.msrb.mxu0 %v279_v12  ;;  %315 = vmatpush.msrb.mxu1 %v280_v13 }
 0x233   :  { %405 = vmatpush.msrb.mxu2 %v381_v14  ;;  %425 = vmatpush.msrb.mxu3 %v382_v15 }
 0x236   :  { %v340_v16 = vpop.permute.xlu0 %339  ;;  %v247_v17 = vpop.permute.xlu1 %246 }
 0x237   :  { %v249_v18 = vsel %vm248_vm7, %v245_v50, %v247_v17  ;;  %v250_v19 = vsel %vm248_vm7, %v247_v17, %v245_v50  ;;  %v240_v22 = vpop.permute.xlu2 %239 }
 0x238   :  { %v277_v23 = vmul.f32 %v249_v18, %v55_v29  ;;  %v278_v20 = vmul.f32 %v250_v19, %v56_v30  ;;  %v274_v29 = vmul.f32 %v896_v4, %v52_v44  ;;  %v47_v30 = vld [vmem:[%s1186_s5 + $0x20] sm:$0xff] }
 0x23a   :  { %296 = vmatpush.msrb.mxu0 %v277_v23  ;;  %316 = vmatpush.msrb.mxu1 %v278_v20 }
 0x23e   :  { %v336_v21 = vpop.permute.xlu0 %335  ;;  %v238_v24 = vpop.permute.xlu1 %237 }
 0x23f   :  { %v242_v25 = vsel %vm241_vm8, %v238_v24, %v240_v22  ;;  %v243_v26 = vsel %vm241_vm8, %v240_v22, %v238_v24  ;;  %v334_v27 = vpop.permute.xlu2 %333 }
 0x240   :  { %v275_v28 = vmul.f32 %v242_v25, %v53_v37  ;;  %v276_v32 = vmul.f32 %v243_v26, %v54_v38  ;;  %v337_v63 = vsel %vm220_vm10, %v334_v27, %v336_v21  ;;  %v338_v4 = vsel %vm220_vm10, %v336_v21, %v334_v27 }
 0x241   :  { %v377_v44 = vmul.f32 %v338_v4, %v45_v40  ;;  %v378_v45 = vmul.f32 %v337_v63, %v46_v41 }
 0x242   :  { %297 = vmatpush.msrb.mxu0 %v275_v28  ;;  %317 = vmatpush.msrb.mxu1 %v276_v32 }
 0x244   :  { %298 = vmatpush.msrb.mxu0 %v273_v33  ;;  %318 = vmatpush.msrb.mxu1 %v274_v29 }
 0x246   :  { %v328_v35 = vpop.permute.xlu0 %327  ;;  %v342_v36 = vpop.permute.xlu1 %341 }
 0x247   :  { %v343_v37 = vsel %vm227_vm11, %v340_v16, %v342_v36  ;;  %v344_v38 = vsel %vm227_vm11, %v342_v36, %v340_v16  ;;  %v233_v39 = vpop.permute.xlu2 %232 }
 0x248   :  { %v379_v42 = vmul.f32 %v344_v38, %v47_v30  ;;  %v380_v43 = vmul.f32 %v343_v37, %v48_v34 }
 0x24a   :  { %406 = vmatpush.msrb.mxu2 %v379_v42  ;;  %426 = vmatpush.msrb.mxu3 %v380_v43 }
 0x24c   :  { %407 = vmatpush.msrb.mxu2 %v377_v44  ;;  %427 = vmatpush.msrb.mxu3 %v378_v45 }
 0x24e   :  { %v226_v46 = vpop.permute.xlu0 %225  ;;  %v231_v47 = vpop.permute.xlu1 %230 }
 0x24f   :  { %v235_v48 = vsel %vm234_vm9, %v231_v47, %v233_v39  ;;  %v236_v49 = vsel %vm234_vm9, %v233_v39, %v231_v47  ;;  %v224_v50 = vpop.permute.xlu2 %223 }
 0x250   :  { %v228_v51 = vsel %vm227_vm11, %v224_v50, %v226_v46  ;;  %v229_v52 = vsel %vm227_vm11, %v226_v46, %v224_v50  ;;  %v271_v53 = vmul.f32 %v236_v49, %v988_v58  ;;  %v272_v54 = vmul.f32 %v235_v48, %v993_v59  ;;  %v36_v49 = vld [vmem:[%s1185_s4 + $0x8] sm:$0xff] }
 0x251   :  { %v269_v55 = vmul.f32 %v229_v52, %v47_v30  ;;  %v270_v56 = vmul.f32 %v228_v51, %v48_v34 }
 0x252   :  { %299 = vmatpush.msrb.mxu0 %v271_v53  ;;  %319 = vmatpush.msrb.mxu1 %v272_v54  ;;  %v40_v54 = vld [vmem:[%s1185_s4 + $0x28] sm:$0xff] }
 0x254   :  { %300 = vmatpush.msrb.mxu0 %v269_v55  ;;  %320 = vmatpush.msrb.mxu1 %v270_v56 }
 0x256   :  { %v330_v61 = vpop.permute.xlu1 %329  ;;  %v208_v18 = vpop.permute.xlu0 %207 }
 0x257   :  { %v331_v58 = vsel %vm213_vm12, %v328_v35, %v330_v61  ;;  %v332_v59 = vsel %vm213_vm12, %v330_v61, %v328_v35  ;;  %v219_v12 = vpop.permute.xlu2 %218 }
 0x258   :  { %v375_v62 = vmul.f32 %v332_v59, %v43_v57  ;;  %v376_v9 = vmul.f32 %v331_v58, %v44_v60 }
 0x25a   :  { %408 = vmatpush.msrb.mxu2 %v375_v62  ;;  %428 = vmatpush.msrb.mxu3 %v376_v9 }
 0x25b   :  { %731 = vmatmul.msk.f32.vlgmr.msrb.gmra.mxu2 %vm283_vm13, %v32_v10  ;;  %732 = vmatmul.msk.f32.vlgmr.msrb.gmra.mxu3 %vm283_vm13, %v32_v10 }
 0x25e   :  { %v217_v13 = vpop.permute.xlu1 %216 }
 0x25f   :  { %v221_v14 = vsel %vm220_vm10, %v217_v13, %v219_v12  ;;  %v222_v15 = vsel %vm220_vm10, %v219_v12, %v217_v13 }
 0x260   :  { %v267_v16 = vmul.f32 %v222_v15, %v45_v40  ;;  %v268_v17 = vmul.f32 %v221_v14, %v46_v41 }
 0x262   :  { %301 = vmatpush.msrb.mxu0 %v267_v16  ;;  %321 = vmatpush.msrb.mxu1 %v268_v17  ;;  %v33_v17 = vld [vmem:[%s1188_s3] sm:$0xff] }
 0x266   :  { %v210_v19 = vpop.permute.xlu1 %209 }
 0x267   :  { %v214_v22 = vsel %vm213_vm12, %v208_v18, %v210_v19  ;;  %v215_v23 = vsel %vm213_vm12, %v210_v19, %v208_v18  ;;  %v34_v18 = vld [vmem:[%s1188_s3 + $0x8] sm:$0xff] }
 0x268   :  { %v265_v20 = vmul.f32 %v215_v23, %v43_v57  ;;  %v266_v21 = vmul.f32 %v214_v22, %v44_v60 }
 0x26a   :  { %302 = vmatpush.msrb.mxu0 %v265_v20  ;;  %322 = vmatpush.msrb.mxu1 %v266_v21 }
 0x26b   :  { %729 = vmatmul.msk.f32.vlgmr.msrb.gmra.mxu0 %vm283_vm13, %v32_v10  ;;  %730 = vmatmul.msk.f32.vlgmr.msrb.gmra.mxu1 %vm283_vm13, %v32_v10 }
 0x2de   :  { %v410_v24 = vpop.f32.mrf.mxu2  ;;  %v430_v25 = vpop.f32.mrf.mxu3 }
 0x2df   :  { %v441_v26 = vmul.f32 %v410_v24, %v410_v24  ;;  %v442_v27 = vmul.f32 %v430_v25, %v430_v25 }
 0x2e8   :  { %v304_v28 = vpop.f32.mrf.mxu0  ;;  %v324_v32 = vpop.f32.mrf.mxu1 }
 0x2e9   :  { %v439_v33 = vmul.f32 %v304_v28, %v304_v28  ;;  %v440_v29 = vmul.f32 %v324_v32, %v324_v32  ;;  %v433_v30 = vadd.f32 %v410_v24, %v304_v28  ;;  %v434_v34 = vadd.f32 %v430_v25, %v324_v32 }
 0x2eb   :  { %v435_v11 = vadd.f32 %v434_v34, %v433_v30  ;;  %v443_v35 = vadd.f32 %v441_v26, %v439_v33  ;;  %v444_v36 = vadd.f32 %v442_v27, %v440_v29 }
 0x2ed   :  { %436 = vadd.xlane.f32.xlu2 %v435_v11  ;;  %v445_v63 = vadd.f32 %v444_v36, %v443_v35 }
 0x2ef   :  { %446 = vadd.xlane.f32.xlu0 %v445_v63 }
 0x360   :  { %v437_v4 = vpop.xlane.xlu2 %436 }
 0x361   :  { %v438_v37 = vmul.f32 %v437_v4, %v870_v31 }
 0x362   :  { %v447_v38 = vpop.xlane.xlu0 %446 }
 0x363   :  { %v449_v39 = vmul.f32 %v438_v37, %v438_v37  ;;  %v448_v40 = vmul.f32 %v447_v38, %v870_v31 }
 0x365   :  { %v450_v41 = vsub.f32 %v448_v40, %v449_v39 }
 0x367   :  { %v451_v42 = vmax.f32 %v450_v41, 0.0 }
 0x369   :  { %v452_v43 = vadd.f32 1e-05, %v451_v42 }
 0x36b   :  { %758 = vrsqrt.f32 %v452_v43  ;;  %vm459_vm15 = vweird.f32 %v452_v43 }
 0x371   :  { %v759_v44 = vpop.eup %758 }
 0x372   :  { %v454_v45 = vmul.f32 %v759_v44, %v452_v43  ;;  %vm460_vm14 = vweird.f32 %v759_v44 }
 0x373   :  { %vm461_vm0 = vmor %vm459_vm15, %vm460_vm14 }
 0x374   :  { %v455_v46 = vmul.f32 %v759_v44, %v454_v45 }
 0x376   :  { %v456_v47 = vmul.f32 0.5, %v455_v46 }
 0x378   :  { %v457_v48 = vsub.f32 1.5, %v456_v47 }
 0x37a   :  { %v458_v50 = vmul.f32 %v759_v44, %v457_v48 }
 0x37c   :  { %v462_v51 = vsel %vm461_vm0, %v759_v44, %v458_v50 }
 0x37d   :  { %v463_v52 = vmul.f32 %v462_v51, %v36_v49 }
 0x37f   :  { %468 = vperm.xlu1 %751, %v463_v52   ;;  %v464_v53 = vmul.f32 %v463_v52, %v438_v37 }
 0x381   :  { %v465_v55 = vsub.f32 %v40_v54, %v464_v53 }
 0x387   :  { %477 = vperm.xlu1 %751, %v465_v55  }
 0x3f1   :  { %v469_v56 = vpop.permute.xlu1 %468 }
 0x3f2   :  { %v471_v57 = vmul.f32 %v469_v56, %v304_v28  ;;  %v472_v60 = vmul.f32 %v469_v56, %v324_v32  ;;  %v473_v61 = vmul.f32 %v469_v56, %v410_v24  ;;  %v474_v58 = vmul.f32 %v469_v56, %v430_v25 }
 0x3f9   :  { %v478_v59 = vpop.permute.xlu1 %477 }
 0x3fa   :  { %v480_v62 = vadd.f32 %v478_v59, %v471_v57  ;;  %v481_v9 = vadd.f32 %v478_v59, %v472_v60  ;;  %v482_v10 = vadd.f32 %v478_v59, %v473_v61  ;;  %v483_v12 = vadd.f32 %v478_v59, %v474_v58 }
 0x3fc   :  { %v484_v13 = vmax.f32 %v480_v62, 0.0  ;;  %v485_v14 = vmax.f32 %v481_v9, 0.0  ;;  %v486_v15 = vmax.f32 %v482_v10, 0.0  ;;  %v487_v16 = vmax.f32 %v483_v12, 0.0 }
 0x3fe   :  { %510 = vmatpush.msra.mxu0 %v484_v13  ;;  %533 = vmatpush.msra.mxu1 %v485_v14  ;;  %v37_v13 = vld [vmem:[%s1185_s4 + $0x10] sm:$0xff] }
 0x3ff   :  { %556 = vmatpush.msra.mxu2 %v486_v15  ;;  %579 = vmatpush.msra.mxu3 %v487_v16 }
 0x400   :  { %737 = vmatmul.msk.f32.vlgmr.msra.gmra.mxu2 %vm488_vm1, %v33_v17  ;;  %739 = vmatmul.msk.f32.vlgmr.msra.gmra.mxu3 %vm488_vm1, %v33_v17 }
 0x401   :  { %733 = vmatmul.msk.f32.vlgmr.msra.gmra.mxu0 %vm488_vm1, %v33_v17  ;;  %735 = vmatmul.msk.f32.vlgmr.msra.gmra.mxu1 %vm488_vm1, %v33_v17 }
 0x408   :  { %738 = vmatmul.msk.f32.gmra.mxu2 %vm488_vm1, %v34_v18  ;;  %740 = vmatmul.msk.f32.gmra.mxu3 %vm488_vm1, %v34_v18 }
 0x409   :  { %734 = vmatmul.msk.f32.gmra.mxu0 %vm488_vm1, %v34_v18  ;;  %736 = vmatmul.msk.f32.gmra.mxu1 %vm488_vm1, %v34_v18 }
 0x47e   :  { %v1087_v19 = vpop.f32.mrf.mxu0  ;;  %v1089_v22 = vpop.f32.mrf.mxu1 }
 0x47f   :  { %v599_v23 = vmul.f32 %v1087_v19, %v1087_v19  ;;  %v600_v20 = vmul.f32 %v1089_v22, %v1089_v22 }
 0x483   :  { %v1095_v21 = vpop.f32.mrf.mxu2  ;;  %v1097_v24 = vpop.f32.mrf.mxu3 }
 0x484   :  { %v603_v25 = vmul.f32 %v1095_v21, %v1095_v21  ;;  %v604_v26 = vmul.f32 %v1097_v24, %v1097_v24  ;;  %v587_v27 = vadd.f32 %v1095_v21, %v1087_v19  ;;  %v588_v28 = vadd.f32 %v1097_v24, %v1089_v22 }
 0x486   :  { %v591_v32 = vadd.f32 %v588_v28, %v587_v27  ;;  %v607_v33 = vadd.f32 %v603_v25, %v599_v23  ;;  %v608_v29 = vadd.f32 %v604_v26, %v600_v20  ;;  %v1107_v34 = vpop.f32.mrf.mxu0  ;;  %v1109_v11 = vpop.f32.mrf.mxu1  ;;  %v38_v28 = vld [vmem:[%s1185_s4 + $0x18] sm:$0xff] }
 0x487   :  { %v601_v35 = vmul.f32 %v1107_v34, %v1107_v34  ;;  %v602_v36 = vmul.f32 %v1109_v11, %v1109_v11 }
 0x488   :  { %592 = vadd.xlane.f32.xlu1 %v591_v32  ;;  %v611_v30 = vadd.f32 %v608_v29, %v607_v33 }
 0x48a   :  { %612 = vadd.xlane.f32.xlu0 %v611_v30 }
 0x48b   :  { %v1115_v63 = vpop.f32.mrf.mxu2  ;;  %v1117_v4 = vpop.f32.mrf.mxu3 }
 0x48c   :  { %v589_v37 = vadd.f32 %v1115_v63, %v1107_v34  ;;  %v605_v38 = vmul.f32 %v1115_v63, %v1115_v63  ;;  %v590_v39 = vadd.f32 %v1117_v4, %v1109_v11  ;;  %v606_v40 = vmul.f32 %v1117_v4, %v1117_v4 }
 0x48e   :  { %v594_v41 = vadd.f32 %v590_v39, %v589_v37  ;;  %v609_v42 = vadd.f32 %v605_v38, %v601_v35  ;;  %v610_v43 = vadd.f32 %v606_v40, %v602_v36  ;;  %v42_v35 = vld [vmem:[%s1185_s4 + $0x38] sm:$0xff] }
 0x490   :  { %595 = vadd.xlane.f32.xlu2 %v594_v41  ;;  %v614_v44 = vadd.f32 %v610_v43, %v609_v42 }
 0x498   :  { %615 = vadd.xlane.f32.xlu2 %v614_v44 }
 0x4fb   :  { %v593_v45 = vpop.xlane.xlu1 %592 }
 0x4fc   :  { %v597_v46 = vmul.f32 %v593_v45, %v870_v31 }
 0x4fd   :  { %v613_v47 = vpop.xlane.xlu0 %612 }
 0x4fe   :  { %v619_v48 = vmul.f32 %v597_v46, %v597_v46  ;;  %v617_v49 = vmul.f32 %v613_v47, %v870_v31 }
 0x500   :  { %v621_v50 = vsub.f32 %v617_v49, %v619_v48 }
 0x502   :  { %v623_v51 = vmax.f32 %v621_v50, 0.0 }
 0x503   :  { %v596_v52 = vpop.xlane.xlu2 %595 }
 0x504   :  { %v625_v53 = vadd.f32 1e-05, %v623_v51  ;;  %v598_v54 = vmul.f32 %v596_v52, %v870_v31 }
 0x506   :  { %760 = vrsqrt.f32 %v625_v53  ;;  %v620_v55 = vmul.f32 %v598_v54, %v598_v54  ;;  %vm633_vm3 = vweird.f32 %v625_v53 }
 0x50b   :  { %v616_v56 = vpop.xlane.xlu2 %615 }
 0x50c   :  { %v761_v57 = vpop.eup %760  ;;  %v618_v60 = vmul.f32 %v616_v56, %v870_v31  ;;  %v41_v31 = vld [vmem:[%s1185_s4 + $0x30] sm:$0xff] }
 0x50d   :  { %v628_v61 = vmul.f32 %v761_v57, %v625_v53  ;;  %vm634_vm2 = vweird.f32 %v761_v57 }
 0x50e   :  { %v622_v58 = vsub.f32 %v618_v60, %v620_v55  ;;  %vm635_vm4 = vmor %vm633_vm3, %vm634_vm2 }
 0x50f   :  { %v629_v59 = vmul.f32 %v761_v57, %v628_v61 }
 0x510   :  { %v624_v62 = vmax.f32 %v622_v58, 0.0 }
 0x511   :  { %v630_v9 = vmul.f32 0.5, %v629_v59 }
 0x512   :  { %v626_v10 = vadd.f32 1e-05, %v624_v62 }
 0x513   :  { %v631_v12 = vsub.f32 1.5, %v630_v9 }
 0x514   :  { %762 = vrsqrt.f32 %v626_v10  ;;  %vm643_vm6 = vweird.f32 %v626_v10 }
 0x515   :  { %v632_v14 = vmul.f32 %v761_v57, %v631_v12 }
 0x517   :  { %v636_v15 = vsel %vm635_vm4, %v761_v57, %v632_v14 }
 0x518   :  { %v647_v16 = vmul.f32 %v636_v15, %v37_v13 }
 0x51a   :  { %v763_v17 = vpop.eup %762  ;;  %655 = vperm.xlu0 %752, %v647_v16   ;;  %v649_v18 = vmul.f32 %v647_v16, %v597_v46 }
 0x51b   :  { %v638_v23 = vmul.f32 %v763_v17, %v626_v10  ;;  %vm644_vm5 = vweird.f32 %v763_v17 }
 0x51c   :  { %v651_v20 = vsub.f32 %v41_v31, %v649_v18  ;;  %vm645_vm7 = vmor %vm643_vm6, %vm644_vm5 }
 0x51d   :  { %v639_v25 = vmul.f32 %v763_v17, %v638_v23 }
 0x51e   :  { %673 = vperm.xlu1 %751, %v651_v20  }
 0x51f   :  { %v640_v26 = vmul.f32 0.5, %v639_v25 }
 0x521   :  { %v641_v27 = vsub.f32 1.5, %v640_v26 }
 0x523   :  { %v642_v32 = vmul.f32 %v763_v17, %v641_v27 }
 0x525   :  { %v646_v33 = vsel %vm645_vm7, %v763_v17, %v642_v32 }
 0x526   :  { %v648_v29 = vmul.f32 %v646_v33, %v38_v28 }
 0x528   :  { %660 = vperm.xlu2 %753, %v648_v29   ;;  %v650_v30 = vmul.f32 %v648_v29, %v598_v54 }
 0x52a   :  { %v652_v36 = vsub.f32 %v42_v35, %v650_v30 }
 0x530   :  { %678 = vperm.xlu2 %753, %v652_v36  }
 0x582   :  { %v661_v37 = vpop.permute.xlu2 %660 }
 0x583   :  { %v665_v38 = vmul.f32 %v661_v37, %v1107_v34  ;;  %v666_v39 = vmul.f32 %v661_v37, %v1109_v11  ;;  %v669_v40 = vmul.f32 %v661_v37, %v1115_v63  ;;  %v670_v41 = vmul.f32 %v661_v37, %v1117_v4 }
 0x58a   :  { %v679_v42 = vpop.permute.xlu2 %678 }
 0x58b   :  { %v683_v43 = vadd.f32 %v679_v42, %v665_v38  ;;  %v684_v44 = vadd.f32 %v679_v42, %v666_v39  ;;  %v687_v45 = vadd.f32 %v679_v42, %v669_v40  ;;  %v688_v46 = vadd.f32 %v679_v42, %v670_v41 }
 0x58c   :  { %v656_v51 = vpop.permute.xlu0 %655 }
 0x58d   :  { %v691_v47 = vmax.f32 %v683_v43, 0.0  ;;  %v692_v48 = vmax.f32 %v684_v44, 0.0  ;;  %v695_v49 = vmax.f32 %v687_v45, 0.0  ;;  %v696_v50 = vmax.f32 %v688_v46, 0.0 }
 0x58e   :  { %v663_v4 = vmul.f32 %v656_v51, %v1087_v19  ;;  %v664_v53 = vmul.f32 %v656_v51, %v1089_v22  ;;  %v667_v54 = vmul.f32 %v656_v51, %v1095_v21  ;;  %v668_v55 = vmul.f32 %v656_v51, %v1097_v24 }
 0x58f   :  { %v699_v52 = vadd.f32 %v691_v47, %v837_v5  ;;  %v700_v34 = vadd.f32 %v692_v48, %v843_v6  ;;  %v703_v11 = vadd.f32 %v695_v49, %v812_v0  ;;  %v704_v63 = vadd.f32 %v696_v50, %v817_v1 }
 0x590   :  { %v674_v56 = vpop.permute.xlu1 %673 }
 0x591   :  { %v707_v57 = vmax.f32 %v699_v52, 0.0  ;;  %v708_v60 = vmax.f32 %v700_v34, 0.0  ;;  %v711_v61 = vmax.f32 %v703_v11, 0.0  ;;  %v712_v58 = vmax.f32 %v704_v63, 0.0 }
 0x592   :  { %v681_v5 = vadd.f32 %v674_v56, %v663_v4  ;;  %v682_v59 = vadd.f32 %v674_v56, %v664_v53  ;;  %v685_v6 = vadd.f32 %v674_v56, %v667_v54  ;;  %v686_v62 = vadd.f32 %v674_v56, %v668_v55 }
 0x593   :  { %715 = vst [vmem:[%s1189_s6 + $0x10] sm:$0xff] %v707_v57 }
 0x594   :  { %716 = vst [vmem:[%s1189_s6 + $0x18] sm:$0xff] %v708_v60  ;;  %v689_v0 = vmax.f32 %v681_v5, 0.0  ;;  %v690_v1 = vmax.f32 %v682_v59, 0.0  ;;  %v693_v19 = vmax.f32 %v685_v6, 0.0  ;;  %v694_v22 = vmax.f32 %v686_v62, 0.0 }
 0x595   :  { %719 = vst [vmem:[%s1189_s6 + $0x30] sm:$0xff] %v711_v61 }
 0x596   :  { %720 = vst [vmem:[%s1189_s6 + $0x38] sm:$0xff] %v712_v58  ;;  %v697_v21 = vadd.f32 %v689_v0, %v848_v7  ;;  %v698_v24 = vadd.f32 %v690_v1, %v855_v8  ;;  %v701_v9 = vadd.f32 %v693_v19, %v822_v2  ;;  %v702_v10 = vadd.f32 %v694_v22, %v829_v3 }
 0x598   :  { %v705_v12 = vmax.f32 %v697_v21, 0.0  ;;  %v706_v13 = vmax.f32 %v698_v24, 0.0  ;;  %v709_v14 = vmax.f32 %v701_v9, 0.0  ;;  %v710_v15 = vmax.f32 %v702_v10, 0.0 }
 0x59a   :  { %713 = vst [vmem:[%s1189_s6] sm:$0xff] %v705_v12 }
 0x59b   :  { %714 = vst [vmem:[%s1189_s6 + $0x8] sm:$0xff] %v706_v13 }
 0x59c   :  { %717 = vst [vmem:[%s1189_s6 + $0x20] sm:$0xff] %v709_v14 }
 0x59d   :  { %718 = vst [vmem:[%s1189_s6 + $0x28] sm:$0xff] %v710_v15 }

</bundles_post_ra>
